<compile_context>
chip_gen: v6e
topology: v6e:2x2x1
jax: 0.10.0
libtpu: 0.0.40
codegen_flags: <defaults>
</compile_context>

<pallas_src>
import jax
import jax.numpy as jnp
from jax import lax
from jax.experimental import pallas as pl
from jax.experimental.pallas import tpu as pltpu


# ---------------------------------------------------------------------------
# Per-chip VMEM sizing.
# ---------------------------------------------------------------------------
def _vmem_budget_bytes():
    """(fused_budget, vmem_limit) in bytes, derived from the chip's VMEM."""
    cap = 64 * 1024 * 1024  # conservative default = v7x per-TC VMEM
    try:
        info = pltpu.get_tpu_info()
        cap = int(getattr(info, "vmem_capacity_bytes", cap)) or cap
    except Exception:
        pass
    # 128 MiB parts (v5e/v6e): ~108 MiB limit / ~100 MiB fused budget
    #  64 MiB parts (v7x)    :   48 MiB limit /   40 MiB fused budget
    limit = min(int(cap * 0.85), cap - (16 << 20))
    limit = max(limit, 32 << 20)
    budget = limit - (8 << 20)
    return budget, limit


def _num_tensorcores():
    """Best-effort TensorCore count (1 if the field is unavailable)."""
    try:
        info = pltpu.get_tpu_info()
        for name in ("num_cores", "tensorcores_per_chip", "num_tensorcores",
                     "core_count"):
            v = getattr(info, name, None)
            if v:
                return int(v)
    except Exception:
        pass
    return 1


def _channel_packing(hw, c):
    """k such that (HW, C) can be viewed lane-densely as (HW//k, k*C)."""
    if c >= 128 or (128 % c) != 0:
        return 1
    k = 128 // c
    return k if hw % k == 0 else 1


def _derive_hw_tile(rows, c_eff, itemsize, vmem_limit):
    """Row-tile for the two-pass path: ~2-4 MiB per buffer, aligned, <= rows."""
    target_buf = min(4 << 20, max(1 << 20, vmem_limit // 16))
    t = target_buf // (c_eff * itemsize)
    align = 16 if itemsize < 4 else 8
    t = max(align, (t // align) * align)
    return min(rows, t)


# ---------------------------------------------------------------------------
# Shared in-kernel math on the (possibly lane-packed) statistics.
# ---------------------------------------------------------------------------
def _fold_groups(sumsq_packed, k, c):
    """(1, k*C) packed per-column sum(x^2)  ->  (1, C) per-channel sum."""
    if k == 1:
        return sumsq_packed
    acc = sumsq_packed[:, 0:c]
    for g in range(1, k):
        acc = acc + sumsq_packed[:, g * c:(g + 1) * c]
    return acc


def _tile_lanes(v, k):
    """(1, C) -> (1, k*C), replicating to match the packed column layout."""
    if k == 1:
        return v
    return jnp.concatenate([v] * k, axis=1)


def _finalize_scale(sumsq_packed, gamma_c_f32, k, c):
    """sum(x^2) per packed column -> packed per-column scale = gamma*Nx + 1."""
    sumsq_c = _fold_groups(sumsq_packed, k, c)                 # (1, C) f32
    gx = jnp.sqrt(sumsq_c)                                     # (1, C)
    mean = jnp.mean(gx, axis=-1, keepdims=True)                # (1, 1)
    nx = gx * pl.reciprocal(mean + 1e-6, approx=False)         # exact: scalar
    scale_c = gamma_c_f32 * nx + 1.0                           # (1, C)
    return _tile_lanes(scale_c, k)                             # (1, k*C)


# ---------------------------------------------------------------------------
# Fused single-pass kernel: one batch element per grid step (1R + 1W of x).
# The reduction and the apply are chunked over rows so no slab-sized f32
# temporary is ever materialized.
# ---------------------------------------------------------------------------
def _make_fused_kernel(rows, c_eff, c, k, chunk):
    n_full = rows // chunk
    rem = rows - n_full * chunk

    def kernel(x_ref, gamma_ref, beta_ref, o_ref):
        # ---- chunked sum(x^2) over rows; stats stay f32, x stays in-dtype ----
        def reduce_body(i, acc):
            r0 = pl.multiple_of(i * chunk, chunk)
            xf = x_ref[pl.ds(r0, chunk), :].astype(jnp.float32)
            return acc + jnp.sum(xf * xf, axis=0, keepdims=True)

        acc = jnp.zeros((1, c_eff), jnp.float32)
        if n_full > 0:
            acc = lax.fori_loop(0, n_full, reduce_body, acc)
        if rem > 0:
            xf = x_ref[pl.ds(n_full * chunk, rem), :].astype(jnp.float32)
            acc = acc + jnp.sum(xf * xf, axis=0, keepdims=True)

        scale = _finalize_scale(acc, gamma_ref[...].astype(jnp.float32),
                                k, c).astype(o_ref.dtype)       # (1, k*C)
        beta = beta_ref[...].astype(o_ref.dtype)                # (1, k*C)

        # ---- folded apply, chunked:  y = x * (gamma*Nx + 1) + beta ----
        def apply_rows(r0, nrows):
            o_ref[pl.ds(r0, nrows), :] = (
                x_ref[pl.ds(r0, nrows), :] * scale + beta).astype(o_ref.dtype)

        if n_full > 0:
            @pl.loop(0, n_full)
            def _(i):
                apply_rows(pl.multiple_of(i * chunk, chunk), chunk)
        if rem > 0:
            apply_rows(n_full * chunk, rem)

    return kernel


# ---------------------------------------------------------------------------
# Two-pass path for large slabs:
#   pass 1: accumulate sum(x^2) over row tiles, finalize per-column scale
#   pass 2: stream x again and apply y = x*scale + beta
# ---------------------------------------------------------------------------
def _make_reduce_kernel(rows_total, tile, c, k):
    ragged = (rows_total % tile) != 0

    def kernel(x_ref, gamma_ref, scale_ref):
        t = pl.program_id(1)

        @pl.when(t == 0)
        def _init():
            scale_ref[...] = jnp.zeros_like(scale_ref)

        xf = x_ref[...].astype(jnp.float32)                     # (tile, k*C)
        if ragged:
            row = lax.broadcasted_iota(jnp.int32, xf.shape, 0) + t * tile
            xf = jnp.where(row < rows_total, xf, 0.0)           # mask OOB rows
        scale_ref[...] += jnp.sum(xf * xf, axis=0, keepdims=True)

        @pl.when(t == pl.num_programs(1) - 1)
        def _finalize():
            scale_ref[...] = _finalize_scale(
                scale_ref[...], gamma_ref[...].astype(jnp.float32), k, c)

    return kernel


def _grn_apply_kernel(x_ref, scale_ref, beta_ref, o_ref):
    x = x_ref[...]                                              # (tile, k*C)
    scale = scale_ref[...].astype(x.dtype)                      # (1, k*C)
    beta = beta_ref[...].astype(x.dtype)                        # (1, k*C)
    # OOB rows of a ragged last tile compute garbage; Pallas drops OOB writes.
    o_ref[...] = (x * scale + beta).astype(o_ref.dtype)


# ---------------------------------------------------------------------------
# Wrapper.
# ---------------------------------------------------------------------------
def grn_pallas(x_nhwc, gamma, beta, *, mode="auto", hw_tile=None):
    """GRN forward. x_nhwc: (N, H, W, C); gamma, beta broadcastable to (1,1,1,C).

    hw_tile (optional) overrides the auto-derived two-pass row tile; it is
    expressed in rows of the (possibly lane-packed) (HW//k, k*C) layout.
    """
    N, H, W, C = x_nhwc.shape
    HW = H * W
    dtype = x_nhwc.dtype
    itemsize = jnp.dtype(dtype).itemsize

    # Lane packing for small C (free contiguous view, identical HBM traffic).
    k = _channel_packing(HW, C)
    rows = HW // k
    c_eff = k * C

    x_flat = x_nhwc.reshape(N, rows, c_eff)
    gamma_c = jnp.asarray(gamma).reshape(1, C)
    beta_c = jnp.asarray(beta).reshape(1, C)
    beta_packed = jnp.tile(beta_c, (1, k)) if k > 1 else beta_c   # (1, k*C)

    fused_budget, vmem_limit = _vmem_budget_bytes()

    slab_io = rows * c_eff * itemsize
    # Fused-kernel reduce/apply chunk: ~256 KiB of f32 temp per chunk.
    chunk = (256 * 1024) // (c_eff * 4)
    chunk = max(8, (chunk // 8) * 8)
    chunk = min(rows, chunk)
    # Fused VMEM estimate: double-buffered in + out slabs, chunk-sized f32
    # temporaries from the chunked reduce, stats/params, + 1 MiB headroom.
    fused_need = 4 * slab_io + 2 * chunk * c_eff * 4 + (1 << 20)

    if mode == "auto":
        if fused_need <= fused_budget:
            mode = "fused"
            # grid=(N,) is the only parallel axis of the fused path; with a
            # single batch element on a multi-TensorCore chip prefer the
            # two-pass path so both cores get work.
            if N == 1 and _num_tensorcores() > 1 and slab_io > (4 << 20):
                mode = "two_pass"
        else:
            mode = "two_pass"

    if mode == "fused":
        out_flat = pl.pallas_call(
            _make_fused_kernel(rows, c_eff, C, k, chunk),
            out_shape=jax.ShapeDtypeStruct((N, rows, c_eff), dtype),
            grid_spec=pltpu.PrefetchScalarGridSpec(
                num_scalar_prefetch=0,
                grid=(N,),
                in_specs=[
                    pl.BlockSpec((pl.Squeezed(), rows, c_eff),
                                 lambda n: (n, 0, 0)),
                    pl.BlockSpec((1, C), lambda n: (0, 0)),
                    pl.BlockSpec((1, c_eff), lambda n: (0, 0)),
                ],
                out_specs=pl.BlockSpec((pl.Squeezed(), rows, c_eff),
                                       lambda n: (n, 0, 0)),
            ),
            compiler_params=pltpu.CompilerParams(
                dimension_semantics=("parallel",),
                vmem_limit_bytes=vmem_limit),
        )(x_flat, gamma_c, beta_packed)
        return out_flat.reshape(N, H, W, C)

    # ---- two-pass: reduce-then-apply over row tiles (ceil-div grid) ----
    if hw_tile is None:
        T = _derive_hw_tile(rows, c_eff, itemsize, vmem_limit)
    else:
        align = 16 if itemsize < 4 else 8
        T = min(rows, max(align, (int(hw_tile) // align) * align))
    n_hw = (rows + T - 1) // T     # ragged last tile allowed (never T = rows fallback)

    scale = pl.pallas_call(
        _make_reduce_kernel(rows, T, C, k),
        out_shape=jax.ShapeDtypeStruct((N, 1, c_eff), jnp.float32),
        grid_spec=pltpu.PrefetchScalarGridSpec(
            num_scalar_prefetch=0,
            grid=(N, n_hw),
            in_specs=[
                pl.BlockSpec((pl.Squeezed(), T, c_eff), lambda n, t: (n, t, 0)),
                pl.BlockSpec((1, C), lambda n, t: (0, 0)),
            ],
            out_specs=pl.BlockSpec((pl.Squeezed(), 1, c_eff),
                                   lambda n, t: (n, 0, 0)),
        ),
        compiler_params=pltpu.CompilerParams(
            dimension_semantics=("parallel", "arbitrary"),
            vmem_limit_bytes=vmem_limit),
    )(x_flat, gamma_c)

    out_flat = pl.pallas_call(
        _grn_apply_kernel,
        out_shape=jax.ShapeDtypeStruct((N, rows, c_eff), dtype),
        grid_spec=pltpu.PrefetchScalarGridSpec(
            num_scalar_prefetch=0,
            grid=(N, n_hw),
            in_specs=[
                pl.BlockSpec((pl.Squeezed(), T, c_eff), lambda n, t: (n, t, 0)),
                pl.BlockSpec((pl.Squeezed(), 1, c_eff), lambda n, t: (n, 0, 0)),
                pl.BlockSpec((1, c_eff), lambda n, t: (0, 0)),
            ],
            out_specs=pl.BlockSpec((pl.Squeezed(), T, c_eff),
                                   lambda n, t: (n, t, 0)),
        ),
        compiler_params=pltpu.CompilerParams(
            dimension_semantics=("parallel", "parallel"),
            vmem_limit_bytes=vmem_limit),
    )(x_flat, scale, beta_packed)
    return out_flat.reshape(N, H, W, C)


def grn_ref(x_nhwc, gamma, beta):
    """Pure-JAX (f32) reference matching the PyTorch forward."""
    xf = x_nhwc.astype(jnp.float32)
    gx = jnp.sqrt(jnp.sum(xf * xf, axis=(1, 2), keepdims=True))   # (N,1,1,C)
    nx = gx / (jnp.mean(gx, axis=-1, keepdims=True) + 1e-6)       # (N,1,1,C)
    g = jnp.asarray(gamma, jnp.float32).reshape(1, 1, 1, -1)
    b = jnp.asarray(beta, jnp.float32).reshape(1, 1, 1, -1)
    return g * (xf * nx) + b + xf


if __name__ == "__main__":
    key = jax.random.PRNGKey(0)
    kx, kg, kb, kx2 = jax.random.split(key, 4)

    # Small f32 case (module-consistent shapes): C=32 exercises the
    # lane-packing path (k=4 -> lane-dense 128-wide blocks).
    N, H, W, C = 2, 8, 8, 32
    x = jax.random.normal(kx, (N, H, W, C), dtype=jnp.float32)
    # The module zero-inits gamma/beta (GRN becomes identity); use small
    # random values so the normalization path is actually exercised.
    gamma = 0.1 * jax.random.normal(kg, (1, 1, 1, C), dtype=jnp.float32)
    beta = 0.1 * jax.random.normal(kb, (1, 1, 1, C), dtype=jnp.float32)

    ref = grn_ref(x, gamma, beta)

    out_fused = grn_pallas(x, gamma, beta, mode="fused")
    jax.block_until_ready(out_fused)
    assert out_fused.shape == (N, H, W, C)
    assert jnp.allclose(out_fused, ref, atol=1e-5, rtol=1e-5), "fused mismatch"

    # Same inputs through the tiled reduce-then-apply path (small hw_tile
    # forces multiple row tiles so the accumulator pattern is exercised).
    out_2p = grn_pallas(x, gamma, beta, mode="two_pass", hw_tile=8)
    jax.block_until_ready(out_2p)
    assert jnp.allclose(out_2p, ref, atol=1e-5, rtol=1e-5), "two-pass mismatch"

    # bf16 I/O case, C=128 (no packing).  hw_tile=96 with 256 rows gives a
    # ragged last tile, exercising the masked reduce + dropped OOB writes.
    N2, H2, W2, C2 = 2, 16, 16, 128
    xb = jax.random.normal(kx2, (N2, H2, W2, C2),
                           dtype=jnp.float32).astype(jnp.bfloat16)
    gb = (0.1 * jax.random.normal(kg, (1, 1, 1, C2),
                                  dtype=jnp.float32)).astype(jnp.bfloat16)
    bb = (0.1 * jax.random.normal(kb, (1, 1, 1, C2),
                                  dtype=jnp.float32)).astype(jnp.bfloat16)
    ref_bf = grn_ref(xb, gb, bb)

    out_bf_2p = grn_pallas(xb, gb, bb, mode="two_pass", hw_tile=96)
    jax.block_until_ready(out_bf_2p)
    assert jnp.allclose(out_bf_2p.astype(jnp.float32), ref_bf,
                        atol=5e-2, rtol=5e-2), "bf16 two-pass mismatch"

    out_bf_auto = grn_pallas(xb, gb, bb, mode="auto")   # fused at this size
    jax.block_until_ready(out_bf_auto)
    assert jnp.allclose(out_bf_auto.astype(jnp.float32), ref_bf,
                        atol=5e-2, rtol=5e-2), "bf16 auto mismatch"

    print("KERNEL_OK")
</pallas_src>

<mosaic_0001>
module attributes {stable_mosaic.version = 11 : i64} {
  func.func @kernel(%arg0: i32, %arg1: memref<1x16x128xf32, #tpu.memory_space<vmem>>, %arg2: memref<1x32xf32, #tpu.memory_space<vmem>>, %arg3: memref<1x128xf32, #tpu.memory_space<vmem>>, %arg4: memref<1x16x128xf32, #tpu.memory_space<vmem>>) attributes {dimension_semantics = [#tpu.dimension_semantics<parallel>], iteration_bounds = array<i64: 2>, scalar_prefetch = 0 : i64, scratch_operands = 0 : i64, tpu.core_type = #tpu.core_type<tc>, window_params = [{transform_indices = @transform_0, window_bounds = array<i64: 1, 16, 128>}, {pipeline_mode = #tpu.pipeline_mode<synchronous>, transform_indices = @transform_1, window_bounds = array<i64: 1, 32>}, {pipeline_mode = #tpu.pipeline_mode<synchronous>, transform_indices = @transform_2, window_bounds = array<i64: 1, 128>}, {transform_indices = @transform_3, window_bounds = array<i64: 1, 16, 128>}]} {
    %cst = arith.constant 0.000000e+00 : f32
    %0 = vector.broadcast %cst : f32 to vector<1x128xf32>
    %c0_i32 = arith.constant 0 : i32
    %c16_i32 = arith.constant 16 : i32
    %1 = arith.muli %c0_i32, %c16_i32 : i32
    %2 = tpu.assume_multiple %1, 16 : i32
    %c0 = arith.constant 0 : index
    %3 = arith.index_cast %2 : i32 to index
    %c0_0 = arith.constant 0 : index
    %4 = vector.load %arg1[%c0, %3, %c0_0] : memref<1x16x128xf32, #tpu.memory_space<vmem>>, vector<1x16x128xf32>
    %5 = vector.shape_cast %4 : vector<1x16x128xf32> to vector<16x128xf32>
    %6 = arith.mulf %5, %5 : vector<16x128xf32>
    %cst_1 = arith.constant dense<0.000000e+00> : vector<128xf32>
    %7 = vector.multi_reduction <add>, %6, %cst_1 [0] : vector<16x128xf32> to vector<128xf32>
    %8 = vector.shape_cast %7 : vector<128xf32> to vector<1x128xf32>
    %9 = arith.addf %0, %8 : vector<1x128xf32>
    %c1_i32 = arith.constant 1 : i32
    %c0_2 = arith.constant 0 : index
    %c0_3 = arith.constant 0 : index
    %10 = vector.load %arg2[%c0_2, %c0_3] : memref<1x32xf32, #tpu.memory_space<vmem>>, vector<1x32xf32>
    %11 = vector.extract_strided_slice %9 {offsets = [0, 0], sizes = [1, 32], strides = [1, 1]} : vector<1x128xf32> to vector<1x32xf32>
    %12 = vector.extract_strided_slice %9 {offsets = [0, 32], sizes = [1, 32], strides = [1, 1]} : vector<1x128xf32> to vector<1x32xf32>
    %13 = arith.addf %11, %12 : vector<1x32xf32>
    %14 = vector.extract_strided_slice %9 {offsets = [0, 64], sizes = [1, 32], strides = [1, 1]} : vector<1x128xf32> to vector<1x32xf32>
    %15 = arith.addf %13, %14 : vector<1x32xf32>
    %16 = vector.extract_strided_slice %9 {offsets = [0, 96], sizes = [1, 32], strides = [1, 1]} : vector<1x128xf32> to vector<1x32xf32>
    %17 = arith.addf %15, %16 : vector<1x32xf32>
    %18 = math.sqrt %17 : vector<1x32xf32>
    %cst_4 = arith.constant dense<0.000000e+00> : vector<1xf32>
    %19 = vector.multi_reduction <add>, %18, %cst_4 [1] : vector<1x32xf32> to vector<1xf32>
    %20 = vector.shape_cast %19 : vector<1xf32> to vector<1x1xf32>
    %cst_5 = arith.constant 3.200000e+01 : f32
    %21 = vector.broadcast %cst_5 : f32 to vector<1x1xf32>
    %22 = arith.divf %20, %21 : vector<1x1xf32>
    %cst_6 = arith.constant 9.99999997E-7 : f32
    %23 = vector.broadcast %cst_6 : f32 to vector<1x1xf32>
    %24 = arith.addf %22, %23 : vector<1x1xf32>
    %25 = tpu.reciprocal %24 : vector<1x1xf32> -> vector<1x1xf32>
    %26 = vector.broadcast %25 : vector<1x1xf32> to vector<1x32xf32>
    %27 = arith.mulf %18, %26 : vector<1x32xf32>
    %28 = arith.mulf %10, %27 : vector<1x32xf32>
    %cst_7 = arith.constant 1.000000e+00 : f32
    %29 = vector.broadcast %cst_7 : f32 to vector<1x32xf32>
    %30 = arith.addf %28, %29 : vector<1x32xf32>
    %31 = tpu.concatenate %30, %30, %30, %30 in 1 : vector<1x32xf32>, vector<1x32xf32>, vector<1x32xf32>, vector<1x32xf32> -> vector<1x128xf32>
    %c0_8 = arith.constant 0 : index
    %c0_9 = arith.constant 0 : index
    %32 = vector.load %arg3[%c0_8, %c0_9] : memref<1x128xf32, #tpu.memory_space<vmem>>, vector<1x128xf32>
    %c0_i32_10 = arith.constant 0 : i32
    %c1_i32_11 = arith.constant 1 : i32
    %33 = arith.muli %c0_i32_10, %c1_i32_11 : i32
    %c0_i32_12 = arith.constant 0 : i32
    %34 = arith.addi %c0_i32_12, %33 : i32
    %c16_i32_13 = arith.constant 16 : i32
    %35 = arith.muli %34, %c16_i32_13 : i32
    %36 = tpu.assume_multiple %35, 16 : i32
    %c0_14 = arith.constant 0 : index
    %37 = arith.index_cast %36 : i32 to index
    %c0_15 = arith.constant 0 : index
    %38 = vector.load %arg1[%c0_14, %37, %c0_15] : memref<1x16x128xf32, #tpu.memory_space<vmem>>, vector<1x16x128xf32>
    %39 = vector.shape_cast %38 : vector<1x16x128xf32> to vector<16x128xf32>
    %40 = vector.broadcast %31 : vector<1x128xf32> to vector<16x128xf32>
    %41 = arith.mulf %39, %40 : vector<16x128xf32>
    %42 = vector.broadcast %32 : vector<1x128xf32> to vector<16x128xf32>
    %43 = arith.addf %41, %42 : vector<16x128xf32>
    %c0_16 = arith.constant 0 : index
    %44 = arith.index_cast %36 : i32 to index
    %c0_17 = arith.constant 0 : index
    %45 = vector.load %arg4[%c0_16, %44, %c0_17] : memref<1x16x128xf32, #tpu.memory_space<vmem>>, vector<1x16x128xf32>
    %46 = vector.shape_cast %45 : vector<1x16x128xf32> to vector<16x128xf32>
    %47 = vector.shape_cast %43 : vector<16x128xf32> to vector<1x16x128xf32>
    tpu.vector_store %arg4[%c0_16, %44, %c0_17], %47 {strides = array<i32>} : memref<1x16x128xf32, #tpu.memory_space<vmem>>, vector<1x16x128xf32>,
    %c1_i32_18 = arith.constant 1 : i32
    return
  }
  func.func @transform_0(%arg0: i32) -> (i32, i32, i32) {
    %c0_i32 = arith.constant 0 : i32
    %c0_i32_0 = arith.constant 0 : i32
    %c0_i32_1 = arith.constant 0 : i32
    return %arg0, %c0_i32, %c0_i32_0 : i32, i32, i32
  }
  func.func @transform_1(%arg0: i32) -> (i32, i32) {
    %c0_i32 = arith.constant 0 : i32
    %c0_i32_0 = arith.constant 0 : i32
    %c0_i32_1 = arith.constant 0 : i32
    return %c0_i32, %c0_i32_0 : i32, i32
  }
  func.func @transform_2(%arg0: i32) -> (i32, i32) {
    %c0_i32 = arith.constant 0 : i32
    %c0_i32_0 = arith.constant 0 : i32
    %c0_i32_1 = arith.constant 0 : i32
    return %c0_i32, %c0_i32_0 : i32, i32
  }
  func.func @transform_3(%arg0: i32) -> (i32, i32, i32) {
    %c0_i32 = arith.constant 0 : i32
    %c0_i32_0 = arith.constant 0 : i32
    %c0_i32_1 = arith.constant 0 : i32
    return %arg0, %c0_i32, %c0_i32_0 : i32, i32, i32
  }
}

</mosaic_0001>

<bundles_post_ra>
// kernel: tpu_custom_call.1
= control target key start
LH: loop header
LB: loop body
LE: loop exit
PB: predicated region body
PF: predicated region fallthrough
CT: control target
= control target key end

     0   :  { %8 = vsyncpa [#allocation3], 0  ;;  %s734_s0 = inlined_call_operand.hbm [shape: f32[2,16,128], index: 0, kind: input, shape index: {}]   ;;  %s735_s1 = inlined_call_operand.vmem [shape: f32[1,32], index: 1, kind: input, shape index: {}]   ;;  %s736_s2 = inlined_call_operand.vmem [shape: f32[1,128], index: 2, kind: input, shape index: {}]   ;;  %s737_s3 = inlined_call_operand.hbm [shape: f32[2,16,128], index: 3, kind: output, shape index: {}]  }
   0x1   :  { %10 = vsyncpa [#allocation3 + $0x1], 0 }
   0x2   :  { %11 = vsyncpa [#allocation4], 0 }
   0x3   :  { %13 = vsyncpa [#allocation4 + $0x1], 0  ;;  %s554_s12 = smov 0   ;;  %s556_s13 = smov 0  }
   0x4   :  { %s558_s14 = smov 0   ;;  %s560_s15 = smov 0  }
   0x5 LB: > { %s575_s16 = sadd.s32 4294967295, %s523_s15   ;;  %s357_s17 = sadd.s32 4294967294, %s523_s15   ;;  %s523_s15 = sphi %s560_s15, %s752_s15   ;;  %s519_s14 = sphi %s558_s14, %s751_s14   ;;  %s515_s13 = sphi %s556_s13, %s750_s13   ;;  %s511_s12 = sphi %s554_s12, %s749_s12  }
   0x6   : > { %s579_s18 = sadd.s32 1, %s523_s15   ;;  %s26_s19 = sadd.s32 1, %s519_s14 }
   0x7   : > { %s23_s20 = ssub.s32 %s523_s15, %s579_s18  ;;  %p33_p0 = scmp.ne.s32.totalorder %s519_s14, %s515_s13 }
   0x8   : > { %p24_p1 = scmp.eq.s32.totalorder %s23_s20, 0  ;;  %p34_p2 = scmp.eq.s32.totalorder %s523_s15, 0 }
   0x9   : > { %p39_p3 = scmp.ne.s32.totalorder %s515_s13, %s511_s12  ;;  %p40_p4 = scmp.eq.s32.totalorder %s575_s16, 0 }
   0xa   : > { %s591_s21 = scalar_select %p24_p1, %s519_s14, %s26_s19  }
   0xb   : > { %p593_p5 = por %p34_p2, %p33_p0  ;;  %p597_p6 = por %p40_p4, %p39_p3 }
   0xc   : > { %p105_p7 = scmp.eq.s32.totalorder %s575_s16, 1  ;;  %p111_p8 = scmp.eq.s32.totalorder %s357_s17, 1 }
   0xd   : > { %s741_s23 = scalar_select %p597_p6, 1, 0 }
   0xe   : > { %p386_p10 = scmp.lt.s32.totalorder %s523_s15, 2  ;;  %p604_p11 = por %p105_p7, %p33_p0 }
   0xf   : > { %p608_p12 = por %p111_p8, %p39_p3  ;;  %s137_s26 = sand.u32 1, %s519_s14  }
  0x10   : > { %s742_s24 = scalar_select %p604_p11, 1, 0 }
  0x11   : > { %s743_s25 = scalar_select %p608_p12, 1, 0 }
  0x12   : > { %s372_s27 = sshll.u32 %s523_s15, 8  ;;  %s360_s28 = sshll.u32 %s137_s26, 4 }
  0x13   : > { %s617_s4 = scalar_lea.hbm %s734_s0, %s372_s27  ;;  %s141_s5 = scalar_lea.vmem [#allocation2], %s360_s28 }
  0x14   : > { %s148_s6 = sshll.u32 %s141_s5, 4  ;;  %p621_p13 = pnand %p386_p10, %p593_p5  ;;  %s625_s6 = int_to_ptr.vmem [resolvable:$true] %s148_s6 }
  0x15   : > { %s627_s8 = scalar_lea.sflag [#allocation3], %s137_s26  ;;  %s431_s9 = scalar_lea.hbm %s617_s4, 256 }
  0x16   : > { %p432_p0 = scmp.ne.s32.totalorder %s617_s4, %s431_s9  ;;  %p433_p1 = pneg %p621_p13 }
  0x17   : > { %s436_s17 = scalar_lea.hbm %s734_s0, 512  ;;  %p437_p4 = scmp.lt.s32.totalorder %s617_s4, %s734_s0 }
  0x18   : > { %p434_p2 = pnand %p433_p1, %p432_p0  ;;  %p438_p5 = scmp.lt.s32.totalorder %s436_s17, %s431_s9 }
  0x1a   : > { %p435_p3 = pneg %p434_p2  ;;  %p439_p7 = por %p438_p5, %p437_p4 }
  0x1c   : > { %p440_p8 = pnand %p439_p7, %p435_p3 }
  0x1e   : > { %443 = shalt.err (!%p440_p8)
}
  0x1f   : > { %s444_s22 = scalar_lea.vmem %s625_s6, 256  ;;  %s525_s26 = smov [#allocation2]  }
  0x20   : > { %p445_p10 = scmp.ne.s32.totalorder %s625_s6, %s444_s22  ;;  %s449_s27 = sshll.u32 %s525_s26, 4  ;;  %s450_s27 = int_to_ptr.vmem [resolvable:$false] %s449_s27 }
  0x21   : > { %s451_s28 = scalar_lea.vmem %s450_s27, 512  ;;  %p452_p2 = scmp.lt.s32.totalorder %s625_s6, %s450_s27 }
  0x22   : > { %p447_p9 = pnand %p445_p10, %p433_p1  ;;  %p453_p12 = scmp.lt.s32.totalorder %s451_s28, %s444_s22 }
  0x24   : > { %p448_p0 = pneg %p447_p9  ;;  %p454_p11 = por %p453_p12, %p452_p2 }
  0x26   : > { %p455_p6 = pnand %p454_p11, %p448_p0 }
  0x28   : > { %458 = shalt.err (!%p455_p6)
}
  0x29   : > { %s526_s29 = smov 128   ;;  %s527_s30 = smov 8  }
  0x2a   : > { %381 = dma.hbm_to_vmem [thread:$0]  (!%p621_p13), %s617_s4, 256, %s625_s6, %s627_s8, %s526_s29, %s526_s29, %s527_s30  }
  0x2b   : > { %p363_p9 = scmp.ge.s32.totalorder %s523_s15, 1  ;;  %p156_p1 = scmp.lt.s32.totalorder %s523_s15, 3 }
  0x2d   : > { %p157_p3 = pnand %p363_p9, %p156_p1 }
  0x2e   : > { %s651_s5 = sand.u32 (!%p157_p3), 1, %s515_s13   ;;  %p745_p6 = scmp.ne.s32.totalorder (!%p157_p3), %s741_s23, 0 }
  0x2f   : > { %160 = sbr.rel (%p157_p3) target bundleno = 520 (0x208), region = 32  ;;  %s364_s9 = sshll.u32 (!%p157_p3), %s651_s5, 4 }
  0x30   : > { %s163_s10 = scalar_lea.sflag (!%p157_p3), [#allocation3], %s651_s5  ;;  %s166_s11 = scalar_lea.vmem (!%p157_p3), [#allocation2], %s364_s9 }
  0x34   : > { %502 = dma.done.wait (%p745_p6), %s163_s10, 256  }
  0x35   : > { %504 = vsyncadd (%p745_p6), %s163_s10, 4294967040  ;;  %v661_v0 = vld [vmem:[%s166_s11] sm:$0xff]  ;;  %v663_v1 = vld [vmem:[%s166_s11 + $0x8] sm:$0xff]  ;;  %s528_s4 = smov 96   ;;  %s529_s23 = smov 32   ;;  %vm222_vm1 = vcmask 253952   ;;  %v234_v26 = vlaneseq }
  0x36   : > { %v191_v2 = vmul.f32 %v661_v0, %v661_v0  ;;  %v192_v3 = vmul.f32 %v663_v1, %v663_v1  ;;  %s530_s6 = smov 64   ;;  %v201_v29 = vld [vmem:[%s735_s1] sm:$0x1]  ;;  %vm247_vm3 = vcmask 261120   ;;  %vm249_vm4 = vcmask 523264   ;;  %s373_s17 = sshll.u32 %s575_s16, 8 }
  0x37   : > { %v235_v27 = vshrl.u32 %v234_v26, 7  ;;  %vm251_vm5 = vcmask 785408   ;;  %s188_s19 = scalar_lea.vmem [#allocation5], %s364_s9  ;;  %v366_v42 = vld [vmem:[%s736_s2] ss:$0 sm:$0xff]  ;;  %s689_s29 = scalar_lea.hbm %s737_s3, %s373_s17 }
  0x38   : > { %v193_v4 = vadd.f32 %v192_v3, %v191_v2  ;;  %s284_s20 = sshll.u32 %s188_s19, 4  ;;  %s271_s16 = scalar_lea.sflag [#allocation4], %s651_s5  ;;  %s691_s20 = int_to_ptr.vmem [resolvable:$true] %s284_s20 }
  0x39   : > { %v236_v32 = vsub.s32 0, %v235_v27  ;;  %s459_s30 = scalar_lea.vmem %s691_s20, 256  ;;  %p746_p12 = scmp.ne.s32.totalorder %s742_s24, 0 }
  0x3a   : > { %v194_v5 = vrot.slane %v193_v4, 4  ;;  %p460_p11 = scmp.ne.s32.totalorder %s691_s20, %s459_s30  ;;  %s531_s9 = smov [#allocation5]  }
  0x3b   : > { %s463_s10 = sshll.u32 %s531_s9, 4  ;;  %s464_s10 = int_to_ptr.vmem [resolvable:$false] %s463_s10 }
  0x3c   : > { %v195_v6 = vadd.f32 %v194_v5, %v193_v4  ;;  %p461_p13 = pnand %p460_p11, %p746_p12  ;;  %s465_s11 = scalar_lea.vmem %s464_s10, 512 }
  0x3d   : > { %p466_p5 = scmp.lt.s32.totalorder %s691_s20, %s464_s10  ;;  %p467_p7 = scmp.lt.s32.totalorder %s465_s11, %s459_s30 }
  0x3e   : > { %v196_v7 = vrot.slane %v195_v6, 2  ;;  %p462_p4 = pneg %p461_p13 }
  0x3f   : > { %p468_p8 = por %p467_p7, %p466_p5 }
  0x40   : > { %v197_v8 = vadd.f32 %v196_v7, %v195_v6 }
  0x41   : > { %p469_p10 = pnand %p468_p8, %p462_p4 }
  0x42   : > { %v198_v9 = vrot.slane %v197_v8, 1 }
  0x44   : > { %v199_v10 = vadd.f32 %v198_v9, %v197_v8 }
  0x46   : > { %203 = vrot.lane.b32.xlu0 %v199_v10, %s528_s4  ;;  %211 = vrot.lane.b32.xlu1 %v199_v10, %s529_s23 }
  0x4a   : > { %207 = vrot.lane.b32.xlu0 %v199_v10, %s530_s6 }
  0xb8   : > { %v204_v11 = vpop.permute.xlu0 %203  ;;  %v212_v14 = vpop.permute.xlu1 %211 }
  0xb9   : > { %v206_v12 = vadd.f32 %v204_v11, %v199_v10 }
  0xbc   : > { %v208_v13 = vpop.permute.xlu0 %207 }
  0xbd   : > { %v210_v15 = vadd.f32 %v208_v13, %v206_v12 }
  0xbf   : > { %v214_v16 = vadd.f32 %v212_v14, %v210_v15 }
  0xc1   : > { %427 = vrsqrt.f32 %v214_v16  ;;  %vm217_vm0 = vcmp.eq.f32.partialorder %v214_v16, inf  ;;  %v220_v19 = vand.u32 2147483648, %v214_v16  ;;  %vm219_vm2 = vcmp.eq.f32.partialorder %v214_v16, 0.0 }
  0xce   : > { %v428_v17 = vpop.eup %427 }
  0xcf   : > { %v216_v18 = vmul.f32 %v428_v17, %v214_v16 }
  0xd1   : > { %v218_v20 = vsel %vm217_vm0, %v214_v16, %v216_v18 }
  0xd2   : > { %v221_v21 = vsel %vm219_vm2, %v220_v19, %v218_v20 }
  0xd3   : > { %v223_v22 = vsel %vm222_vm1, %v221_v21, 0.0 }
  0xd4   : > { %224 = vadd.xlane.f32.xlu1 %v223_v22 }
 0x15d   : > { %v225_v23 = vpop.xlane.xlu1 %224 }
 0x15e   : > { %v227_v24 = vmul.f32 0.03125, %v225_v23 }
 0x160   : > { %v228_v25 = vadd.f32 1e-06, %v227_v24 }
 0x162   : > { %429 = vrcp.f32 %v228_v25 }
 0x16f   : > { %v430_v28 = vpop.eup %429 }
 0x170   : > { %v230_v30 = vmul.f32 %v430_v28, %v221_v21 }
 0x172   : > { %v231_v31 = vmul.f32 %v230_v30, %v201_v29 }
 0x174   : > { %v232_v33 = vadd.f32 1.0, %v231_v31 }
 0x176   : > { %v237_v34 = vrot.slane %v232_v33, %v236_v32 }
 0x178   : > { %238 = vrot.lane.b32.xlu0 %v237_v34, %s529_s23 }
 0x17c   : > { %241 = vrot.lane.b32.xlu0 %v237_v34, %s530_s6 }
 0x180   : > { %244 = vrot.lane.b32.xlu0 %v237_v34, %s528_s4 }
 0x1ea   : > { %v239_v35 = vpop.permute.xlu0 %238 }
 0x1eb   : > { %v248_v37 = vsel %vm247_vm3, %v232_v33, %v239_v35 }
 0x1ee   : > { %v242_v36 = vpop.permute.xlu0 %241 }
 0x1ef   : > { %v250_v38 = vsel %vm249_vm4, %v248_v37, %v242_v36 }
 0x1f2   : > { %v245_v39 = vpop.permute.xlu0 %244 }
 0x1f3   : > { %v252_v40 = vsel %vm251_vm5, %v250_v38, %v245_v39 }
 0x1f4   : > { %v257_v41 = vrot.slane %v252_v40, %v236_v32 }
 0x1f6   : > { %v258_v43 = vmul.f32 %v257_v41, %v661_v0  ;;  %v259_v44 = vmul.f32 %v257_v41, %v663_v1 }
 0x1f8   : > { %v266_v45 = vadd.f32 %v366_v42, %v258_v43  ;;  %v267_v46 = vadd.f32 %v366_v42, %v259_v44 }
 0x1fa   : > { %268 = vst [vmem:[%s188_s19] sm:$0xff] %v266_v45  ;;  %269 = vst [vmem:[%s188_s19 + $0x8] sm:$0xff] %v267_v46 }
 0x1fb   : > { %472 = shalt.err (!%p469_p10)
}
 0x1fc   : > { %s473_s4 = scalar_lea.hbm %s689_s29, 256  ;;  %s477_s7 = scalar_lea.hbm %s737_s3, 512 }
 0x1fd   : > { %p474_p0 = scmp.ne.s32.totalorder %s689_s29, %s473_s4  ;;  %p478_p1 = scmp.lt.s32.totalorder %s689_s29, %s737_s3 }
 0x1fe   : > { %p479_p3 = scmp.lt.s32.totalorder %s477_s7, %s473_s4 }
 0x1ff   : > { %p475_p2 = pnand %p474_p0, %p746_p12 }
 0x200   : > { %p480_p6 = por %p479_p3, %p478_p1 }
 0x201   : > { %p476_p9 = pneg %p475_p2 }
 0x203   : > { %p481_p11 = pnand %p480_p6, %p476_p9 }
 0x205   : > { %484 = shalt.err (!%p481_p11)
}
 0x206   : > { %s532_s19 = smov 128   ;;  %s533_s22 = smov 8  }
 0x207   : > { %376 = dma.vmem_to_hbm [thread:$0]  (%p746_p12), %s691_s20, 256, %s689_s29, %s271_s16, %s532_s19, %s532_s19, %s533_s22  }
 0x208 PF: > { %s299_s26 = sand.u32 1, %s511_s12   ;;  %p747_p13 = scmp.ne.s32.totalorder %s743_s25, 0 }
 0x209   : > { %p748_p4 = scmp.ge.s32.totalorder %s523_s15, 2  ;;  %s300_s27 = scalar_lea.sflag [#allocation4], %s299_s26 }
 0x20b   : > { %p383_p5 = pnand %p748_p4, %p747_p13 }
 0x20d   : > { %p384_p7 = pneg %p383_p5 }
 0x20f   : > { %506 = dma.done.wait (%p384_p7), %s300_s27, 256  }
 0x210   : > { %508 = vsyncadd (%p384_p7), %s300_s27, 4294967040  ;;  %p16_p8 = scmp.ge.s32.totalorder %s579_s18, 4   ;;  %s749_s12 = smov %s515_s13 }
 0x211   : > { %s750_s13 = smov %s519_s14  ;;  %s751_s14 = smov %s591_s21 }
 0x212   : > { %s752_s15 = smov %s579_s18  ;;  %18 = sbr.rel (!%p16_p8) target bundleno = 5 (0x5), region = 77 }
 0x217   :  { %305 = vsyncpa [#allocation3], 1 }
 0x218   :  { %307 = vsyncpa [#allocation3 + $0x1], 1 }
 0x219   :  { %308 = vsyncpa [#allocation4], 1 }
 0x21a   :  { %310 = vsyncpa [#allocation4 + $0x1], 1 }

</bundles_post_ra>
